<compile_context>
chip_gen: v5e
topology: v5e:2x2
jax: 0.10.0
libtpu: 0.0.40
codegen_flags: <defaults>
</compile_context>

<pallas_src>
import functools

import jax
import jax.numpy as jnp
from jax.experimental import pallas as pl
from jax.experimental.pallas import tpu as pltpu


def coral_kernel(x_ref, w_ref, b_ref, o_ref):
    # x_ref: (TM, F)  w_ref: (1, F)  b_ref: (1, K)  o_ref: (TM, K)
    x = x_ref[...].astype(jnp.float32)            # upcast (needed on v5e for bf16)
    w = w_ref[...].astype(jnp.float32)            # lane-dense weight row
    # VPU multiply + XLU lane reduce -> per-example scalar score, f32 accumulate.
    score = jnp.sum(x * w, axis=-1, keepdims=True)          # (TM, 1)
    # Broadcast-add ordinal thresholds on the VPU.
    o_ref[...] = (score + b_ref[...]).astype(o_ref.dtype)   # (TM, K)


def _sublane_multiple(dtype) -> int:
    itemsize = jnp.dtype(dtype).itemsize
    if itemsize >= 4:
        return 8
    if itemsize == 2:
        return 16
    return 32


def _align_up(v, m):
    return ((v + m - 1) // m) * m


def _choose_tm(n, f, dtype, k, *, target_bytes, vmem_limit_bytes, min_grid_steps=8):
    """Row tile size.

    Budgets VMEM with lane padding (x block pads F to 128-lane multiples, out block
    pads K<128 to 128 lanes, plus the f32 upcast temp of the x block), targets
    ~target_bytes per streamed x buffer, and keeps >= min_grid_steps grid steps when
    N allows so v7x megacore sharding and pipelining stay engaged.
    """
    sub = _sublane_multiple(dtype)
    itemsize = jnp.dtype(dtype).itemsize
    f_pad = _align_up(f, 128)                 # lane-padded x block width in VMEM
    k_pad = _align_up(k, 128)                 # lane-padded out block width (f32)

    # Per-row VMEM bytes:
    #   2x double-buffered x input block (streamed dtype)
    #   2x double-buffered f32 output block (lane-padded to 128)
    #   1x f32 upcast temporary of the x block inside the kernel body
    per_row = 2 * f_pad * itemsize + 2 * k_pad * 4 + f_pad * 4
    budget = int(vmem_limit_bytes * 0.75)     # headroom for compiler scratch
    tm_budget = max(sub, (budget // per_row) // sub * sub)

    # Target ~target_bytes per streamed x buffer (amortizes ~0.35us per-step overhead).
    tm_target = max(sub, (target_bytes // max(f_pad * itemsize, 1)) // sub * sub)

    tm = min(tm_budget, tm_target)

    # Keep >= min_grid_steps grid steps when N allows it (megacore + overlap).
    tm_steps = max(sub, _align_up(pl.cdiv(n, min_grid_steps), sub))
    tm = min(tm, tm_steps)

    # Never larger than one sublane-aligned block covering all of N.
    return max(sub, min(tm, _align_up(n, sub)))


@functools.partial(jax.jit,
                   static_argnames=("tm", "target_bytes", "vmem_limit_bytes"))
def coral_layer_forward(x, w, bias, *, tm=None,
                        target_bytes=8 * 1024 * 1024,
                        vmem_limit_bytes=48 * 1024 * 1024):
    """x: (N, F); w: (F, 1) or (1, F) or (F,); bias: (K,). Returns (N, K) float32."""
    N, F = x.shape
    K = bias.shape[0]

    sub = _sublane_multiple(x.dtype)
    if tm is None:
        tm = _choose_tm(N, F, x.dtype, K,
                        target_bytes=target_bytes,
                        vmem_limit_bytes=vmem_limit_bytes)
    tm = max(sub, (tm // sub) * sub)          # enforce sublane alignment

    w_row = jnp.reshape(w, (1, F))            # lane-dense (1, F) weight row
    bias2d = jnp.reshape(bias, (1, K)).astype(jnp.float32)

    # Ragged N: grid = cdiv(N, tm); Pallas masks the tail block's writeback.  Each
    # output row depends only on its own input row, so OOB reads in the tail never
    # reach a kept output.  No padding / slicing passes over HBM.
    out = pl.pallas_call(
        coral_kernel,
        out_shape=jax.ShapeDtypeStruct((N, K), jnp.float32),
        grid_spec=pl.GridSpec(
            grid=(pl.cdiv(N, tm),),
            in_specs=[
                pl.BlockSpec((tm, F), lambda i: (i, 0)),   # x row-tile (streamed)
                pl.BlockSpec((1, F), lambda i: (0, 0)),    # weight row (resident)
                pl.BlockSpec((1, K), lambda i: (0, 0)),    # bias (resident)
            ],
            out_specs=pl.BlockSpec((tm, K), lambda i: (i, 0)),
        ),
        compiler_params=pltpu.CompilerParams(
            dimension_semantics=("parallel",),             # megacore on v7x
            vmem_limit_bytes=vmem_limit_bytes,             # safe on 64 MiB v7x VMEM
        ),
    )(x, w_row, bias2d)
    return out


def reference_forward(x, w, bias):
    score = x.astype(jnp.float32) @ jnp.reshape(w, (-1, 1)).astype(jnp.float32)  # (N, 1)
    return score + bias.reshape(1, -1).astype(jnp.float32)                       # (N, K)


if __name__ == "__main__":
    key = jax.random.PRNGKey(0)
    kx, kw, kx2, kw2, kx3, kw3 = jax.random.split(key, 6)

    C = 10
    K = C - 1
    bias = jnp.arange(K, 0, -1, dtype=jnp.float32) / jnp.float32(K)   # preinit_bias=True

    # --- Test 1: tiny shapes consistent with the module, f32, auto tile (single block).
    N, F = 8, 32
    x = jax.random.normal(kx, (N, F), dtype=jnp.float32)
    bound = 1.0 / jnp.sqrt(jnp.float32(F))
    w = jax.random.uniform(kw, (F, 1), minval=-bound, maxval=bound, dtype=jnp.float32)

    out = jax.block_until_ready(coral_layer_forward(x, w, bias))
    ref = reference_forward(x, w, bias)
    assert out.shape == (N, K), out.shape
    assert jnp.allclose(out, ref, atol=1e-5, rtol=1e-5), \
        f"max abs err {jnp.max(jnp.abs(out - ref))}"

    # --- Test 2: ragged N, bf16 streaming, auto tile -> multi-step grid with a masked
    #             tail block (200 % tm != 0), f32 accumulation in-kernel.
    N2, F2 = 200, 64
    x2 = jax.random.normal(kx2, (N2, F2), dtype=jnp.float32).astype(jnp.bfloat16)
    bound2 = 1.0 / jnp.sqrt(jnp.float32(F2))
    w2 = jax.random.uniform(kw2, (F2, 1), minval=-bound2, maxval=bound2,
                            dtype=jnp.float32).astype(jnp.bfloat16)

    out2 = jax.block_until_ready(coral_layer_forward(x2, w2, bias))
    ref2 = reference_forward(x2, w2, bias)   # reference on the same bf16 inputs (f32 math)
    assert out2.shape == (N2, K), out2.shape
    assert jnp.allclose(out2, ref2, atol=1e-4, rtol=1e-4), \
        f"max abs err {jnp.max(jnp.abs(out2 - ref2))}"

    # --- Test 3: explicit tile override, f32, ragged last block (200 = 3*64 + 8).
    N3, F3 = 200, 32
    x3 = jax.random.normal(kx3, (N3, F3), dtype=jnp.float32)
    bound3 = 1.0 / jnp.sqrt(jnp.float32(F3))
    w3 = jax.random.uniform(kw3, (F3, 1), minval=-bound3, maxval=bound3,
                            dtype=jnp.float32)

    out3 = jax.block_until_ready(coral_layer_forward(x3, w3, bias, tm=64))
    ref3 = reference_forward(x3, w3, bias)
    assert out3.shape == (N3, K), out3.shape
    assert jnp.allclose(out3, ref3, atol=1e-5, rtol=1e-5), \
        f"max abs err {jnp.max(jnp.abs(out3 - ref3))}"

    print("KERNEL_OK")
</pallas_src>

<mosaic_0001>
module attributes {stable_mosaic.version = 11 : i64} {
  func.func @coral_kernel(%arg0: i32, %arg1: memref<8x32xf32, #tpu.memory_space<vmem>>, %arg2: memref<1x32xf32, #tpu.memory_space<vmem>>, %arg3: memref<1x9xf32, #tpu.memory_space<vmem>>, %arg4: memref<8x9xf32, #tpu.memory_space<vmem>>) attributes {dimension_semantics = [#tpu.dimension_semantics<parallel>], iteration_bounds = array<i64: 1>, scalar_prefetch = 0 : i64, scratch_operands = 0 : i64, tpu.core_type = #tpu.core_type<tc>, window_params = [{transform_indices = @transform_0, window_bounds = array<i64: 8, 32>}, {pipeline_mode = #tpu.pipeline_mode<synchronous>, transform_indices = @transform_1, window_bounds = array<i64: 1, 32>}, {pipeline_mode = #tpu.pipeline_mode<synchronous>, transform_indices = @transform_2, window_bounds = array<i64: 1, 9>}, {transform_indices = @transform_3, window_bounds = array<i64: 8, 9>}]} {
    %c0 = arith.constant 0 : index
    %c0_0 = arith.constant 0 : index
    %0 = vector.load %arg1[%c0, %c0_0] : memref<8x32xf32, #tpu.memory_space<vmem>>, vector<8x32xf32>
    %c0_1 = arith.constant 0 : index
    %c0_2 = arith.constant 0 : index
    %1 = vector.load %arg2[%c0_1, %c0_2] : memref<1x32xf32, #tpu.memory_space<vmem>>, vector<1x32xf32>
    %2 = vector.broadcast %1 : vector<1x32xf32> to vector<8x32xf32>
    %3 = arith.mulf %0, %2 : vector<8x32xf32>
    %cst = arith.constant dense<0.000000e+00> : vector<8xf32>
    %4 = vector.multi_reduction <add>, %3, %cst [1] : vector<8x32xf32> to vector<8xf32>
    %5 = vector.shape_cast %4 : vector<8xf32> to vector<8x1xf32>
    %c0_3 = arith.constant 0 : index
    %c0_4 = arith.constant 0 : index
    %6 = vector.load %arg3[%c0_3, %c0_4] : memref<1x9xf32, #tpu.memory_space<vmem>>, vector<1x9xf32>
    %7 = vector.broadcast %5 : vector<8x1xf32> to vector<8x9xf32>
    %8 = vector.broadcast %6 : vector<1x9xf32> to vector<8x9xf32>
    %9 = arith.addf %7, %8 : vector<8x9xf32>
    %c0_5 = arith.constant 0 : index
    %c0_6 = arith.constant 0 : index
    %10 = vector.load %arg4[%c0_5, %c0_6] : memref<8x9xf32, #tpu.memory_space<vmem>>, vector<8x9xf32>
    tpu.vector_store %arg4[%c0_5, %c0_6], %9 {strides = array<i32>} : memref<8x9xf32, #tpu.memory_space<vmem>>, vector<8x9xf32>,
    return
  }
  func.func @transform_0(%arg0: i32) -> (i32, i32) {
    %c0_i32 = arith.constant 0 : i32
    %c0_i32_0 = arith.constant 0 : i32
    return %arg0, %c0_i32 : i32, i32
  }
  func.func @transform_1(%arg0: i32) -> (i32, i32) {
    %c0_i32 = arith.constant 0 : i32
    %c0_i32_0 = arith.constant 0 : i32
    %c0_i32_1 = arith.constant 0 : i32
    return %c0_i32, %c0_i32_0 : i32, i32
  }
  func.func @transform_2(%arg0: i32) -> (i32, i32) {
    %c0_i32 = arith.constant 0 : i32
    %c0_i32_0 = arith.constant 0 : i32
    %c0_i32_1 = arith.constant 0 : i32
    return %c0_i32, %c0_i32_0 : i32, i32
  }
  func.func @transform_3(%arg0: i32) -> (i32, i32) {
    %c0_i32 = arith.constant 0 : i32
    %c0_i32_0 = arith.constant 0 : i32
    return %arg0, %c0_i32 : i32, i32
  }
}

</mosaic_0001>

<bundles_post_ra>
// kernel: coral_layer_forward.1
= control target key start
LH: loop header
LB: loop body
LE: loop exit
PB: predicated region body
PF: predicated region fallthrough
CT: control target
= control target key end

     0   :  { %8 = vsyncpa [#allocation3], 0  ;;  %s153_s0 = inlined_call_operand.hbm [shape: f32[8,32], index: 0, kind: input, shape index: {}]   ;;  %s154_s1 = inlined_call_operand.vmem [shape: f32[1,32], index: 1, kind: input, shape index: {}]   ;;  %s155_s2 = inlined_call_operand.vmem [shape: f32[1,9], index: 2, kind: input, shape index: {}]   ;;  %s156_s3 = inlined_call_operand.hbm [shape: f32[8,9], index: 3, kind: output, shape index: {}]  }
   0x1   :  { %9 = vsyncpa [#allocation4], 0  ;;  %s15_s14 = sshll.u32 %s153_s0, 4  ;;  %s119_s15 = smov [#allocation2]   ;;  %s16_s14 = int_to_ptr.hbm [resolvable:$true] %s15_s14 }
   0x2   :  { %s17_s16 = sshll.u32 %s119_s15, 4  ;;  %s18_s16 = int_to_ptr.vmem [resolvable:$true] %s17_s16 }
   0x3   :  { %20 = dma.hbm_to_vmem [thread:$0]  %s16_s14, 128, %s18_s16, [#allocation3]  }
   0x4   :  { %115 = dma.done.wait [#allocation3], 128  }
   0x5   :  { %116 = vsyncadd [#allocation3], 4294967168  ;;  %v29_v0 = vld [vmem:[#allocation2] sm:$0xff]  ;;  %vm35_vm0 = vcmask 261120   ;;  %s120_s0 = smov [#allocation5]   ;;  %s53_s24 = sshll.u32 %s156_s3, 4  ;;  %s54_s24 = int_to_ptr.hbm [resolvable:$true] %s53_s24 }
   0x6   :  { %v65_v1 = vld [vmem:[%s154_s1] ss:$0 sm:$0xff]  ;;  %s51_s21 = sshll.u32 %s120_s0, 4  ;;  %vm44_vm1 = vcmask 72704   ;;  %s52_s21 = int_to_ptr.vmem [resolvable:$true] %s51_s21 }
   0x7   :  { %v34_v2 = vmul.f32 %v65_v1, %v29_v0  ;;  %v66_v4 = vld [vmem:[%s155_s2] ss:$0 sm:$0xff] }
   0x9   :  { %v36_v3 = vsel %vm35_vm0, %v34_v2, 0.0 }
   0xa   :  { %37 = vadd.xlane.f32.xlu0 %v36_v3 }
  0x7d   :  { %v38_v5 = vpop.xlane.xlu0 %37 }
  0x7e   :  { %v43_v6 = vadd.f32 %v66_v4, %v38_v5 }
  0x80   :  { %45 = vst.msk [vmem:[#allocation5] sm:$0xff] %vm44_vm1, %v43_v6 }
  0x81   :  { %56 = dma.vmem_to_hbm [thread:$0]  %s52_s21, 128, %s54_s24, [#allocation4]  }
  0x82   :  { %117 = dma.done.wait [#allocation4], 128  }
  0x83   :  { %118 = vsyncadd [#allocation4], 4294967168 }
  0x84   :  { %61 = vsyncpa [#allocation3], 1 }
  0x85   :  { %62 = vsyncpa [#allocation4], 1 }

</bundles_post_ra>
